<compile_context>
chip_gen: v5e
topology: v5e:2x2
jax: 0.10.0
libtpu: 0.0.40
codegen_flags: <defaults>
</compile_context>

<pallas_src>
import math
import jax
import jax.numpy as jnp
from jax import lax
from jax.experimental import pallas as pl
from jax.experimental.pallas import tpu as pltpu


_MiB = 1024 * 1024
_VMEM_BUDGET = 40 * _MiB        # target per-kernel working set
_VMEM_CAP = 48 * _MiB           # never request more scoped VMEM than this (v7x-safe)


# ------------------------------ small helpers ------------------------------ #

def _const_spec(shape, index_map):
    """BlockSpec for a block whose index map is constant across the grid.

    Single-buffer it (pl.Buffered(1)) — double-buffering a never-changing weight block
    only wastes VMEM.  Falls back to a plain BlockSpec if this jax version's BlockSpec
    has no pipeline_mode argument.
    """
    if hasattr(pl, "Buffered"):
        try:
            return pl.BlockSpec(shape, index_map, pipeline_mode=pl.Buffered(1))
        except TypeError:
            pass
    return pl.BlockSpec(shape, index_map)


def _vmem_limit(need_bytes):
    return int(min(max(need_bytes + 2 * _MiB, 4 * _MiB), _VMEM_CAP))


def _proj_vmem_need(tm, d):
    weights = 4 * (5 * d * d + 5 * d)                              # single-buffered
    tiles = 4 * 2 * (3 * tm * d + 3 * tm * d + 2 * tm * 2 * d)     # double-buffered in/out
    return weights + tiles


def _pick_row_tile(m, d, budget=_VMEM_BUDGET, cap=512):
    """Largest multiple-of-8 row tile <= cap whose working set fits the VMEM budget.

    The grid uses pl.cdiv + zero padding, so the tile does NOT have to divide m.
    """
    t = min(cap, max(8, ((m + 7) // 8) * 8))
    t = max(8, (t // 8) * 8)
    while t > 8 and _proj_vmem_need(t, d) > budget:
        t = max(8, ((t // 2) // 8) * 8)
    return t


def _attn_vmem_need(tq, l, d, h):
    per_step = (tq * d + 2 * l * d + tq * 2 * d + l * 2 * d + h * tq * l   # inputs
                + 3 * tq * d)                                              # outputs
    consts = d * d + d                                                     # w_concat, bias
    return 4 * (2 * per_step + consts)


def _pick_q_tile(l, d, h, budget=_VMEM_BUDGET, cap=256):
    """Query-row tile (full L, or a multiple-of-8 divisor of L) fitting the budget."""
    cands = ([l] if l <= cap else []) + [t for t in (256, 128, 64, 32, 16, 8)
                                         if t < l and l % t == 0]
    for t in cands:
        if _attn_vmem_need(t, l, d, h) <= budget:
            return t
    return cands[-1] if cands else l


# --------------------------- fused projection kernel ------------------------ #

def _fused_proj_kernel(xq_ref, xk_ref, xv_ref,
                       wq_ref, bq_ref, wk_ref, bk_ref, wv_ref, bv_ref,
                       wmv_ref, bmv_ref,
                       qp_ref, kp_ref, vp_ref, qmv_ref, kmv_ref):
    # Row tile of the flattened [B*L, D] activations; all weights resident in VMEM.
    qp = jnp.dot(xq_ref[...], wq_ref[...], preferred_element_type=jnp.float32) + bq_ref[...]
    kp = jnp.dot(xk_ref[...], wk_ref[...], preferred_element_type=jnp.float32) + bk_ref[...]
    vp = jnp.dot(xv_ref[...], wv_ref[...], preferred_element_type=jnp.float32) + bv_ref[...]
    qp_ref[...] = qp.astype(qp_ref.dtype)
    kp_ref[...] = kp.astype(kp_ref.dtype)
    vp_ref[...] = vp.astype(vp_ref.dtype)
    # Chained mu|var projections: one [TM, D] x [D, 2D] MXU pass per path; the
    # intermediates (qp, kp) never leave VMEM/vregs.
    wmv = wmv_ref[...]
    bmv = bmv_ref[...]
    qmv_ref[...] = (jnp.dot(qp, wmv, preferred_element_type=jnp.float32) + bmv).astype(qmv_ref.dtype)
    kmv_ref[...] = (jnp.dot(kp, wmv, preferred_element_type=jnp.float32) + bmv).astype(kmv_ref.dtype)


def fused_qkv_muvar(aq, ak, av, params):
    """One launch: w_q/w_k/w_v projections + chained, fused qk_mu|qk_var of q/k paths."""
    B, L, D = aq.shape
    M = B * L
    TM = _pick_row_tile(M, D)
    grid_m = pl.cdiv(M, TM)
    Mp = grid_m * TM

    def prep(x):
        x2 = x.reshape(M, D)
        if Mp != M:                       # pad the ragged tail tile with zero rows
            x2 = jnp.pad(x2, ((0, Mp - M), (0, 0)))
        return x2

    xq, xk, xv = prep(aq), prep(ak), prep(av)
    # mu/var weights fused into one wide RHS (in production this would be precomputed once)
    wmv = jnp.concatenate([params["qk_mu_w"][0], params["qk_var_w"][0]], axis=1)   # [D, 2D]
    bmv = jnp.concatenate([params["qk_mu_b"][0], params["qk_var_b"][0]], axis=1)   # [1, 2D]

    row_spec = pl.BlockSpec((TM, D), lambda i: (i, 0))
    row2_spec = pl.BlockSpec((TM, 2 * D), lambda i: (i, 0))
    w_spec = _const_spec((D, D), lambda i: (0, 0))
    b_spec = _const_spec((1, D), lambda i: (0, 0))
    wmv_spec = _const_spec((D, 2 * D), lambda i: (0, 0))
    bmv_spec = _const_spec((1, 2 * D), lambda i: (0, 0))

    outs = pl.pallas_call(
        _fused_proj_kernel,
        out_shape=(jax.ShapeDtypeStruct((Mp, D), jnp.float32),
                   jax.ShapeDtypeStruct((Mp, D), jnp.float32),
                   jax.ShapeDtypeStruct((Mp, D), jnp.float32),
                   jax.ShapeDtypeStruct((Mp, 2 * D), jnp.float32),
                   jax.ShapeDtypeStruct((Mp, 2 * D), jnp.float32)),
        grid=(grid_m,),
        in_specs=[row_spec, row_spec, row_spec,
                  w_spec, b_spec, w_spec, b_spec, w_spec, b_spec,
                  wmv_spec, bmv_spec],
        out_specs=(row_spec, row_spec, row_spec, row2_spec, row2_spec),
        compiler_params=pltpu.CompilerParams(
            dimension_semantics=("parallel",),
            vmem_limit_bytes=_vmem_limit(_proj_vmem_need(TM, D))),
    )(xq, xk, xv,
      params["w_q_w"], params["w_q_b"],
      params["w_k_w"], params["w_k_b"],
      params["w_v_w"], params["w_v_b"],
      wmv, bmv)

    if Mp != M:
        outs = tuple(o[:M] for o in outs)
    qp, kp, vp, qmv, kmv = outs
    return (qp.reshape(B, L, D), kp.reshape(B, L, D), vp.reshape(B, L, D),
            qmv.reshape(B, L, 2 * D), kmv.reshape(B, L, 2 * D))


# ------------------------- probabilistic attention kernel ------------------- #

def _make_prob_attn_kernel(n_head):
    def kernel(q_ref, k_ref, v_ref, qmv_ref, kmv_ref, eps_ref, wc_ref, bc_ref,
               out_ref, attn_ref, attention_ref):
        q = q_ref[0]        # [TQ, D]
        k = k_ref[0]        # [L, D]
        v = v_ref[0]        # [L, D]
        qmv = qmv_ref[0]    # [TQ, 2D]  (mu | var columns)
        kmv = kmv_ref[0]    # [L, 2D]
        D = q.shape[-1]
        dt = D // n_head
        scale = 1.0 / math.sqrt(dt)
        nt = (((1,), (1,)), ((), ()))    # contract last dims == A @ B.T, no XLU transpose

        # TODO(synk): mask support of ProbScaleDotProductAttention is undefined in the
        # reference; only mask=None is implemented.
        o_parts, s_parts, a_parts = [], [], []
        for h in range(n_head):
            cs = slice(h * dt, (h + 1) * dt)            # head columns (activations / mu half)
            vs = slice(D + h * dt, D + (h + 1) * dt)    # head columns (var half)
            scores = lax.dot_general(q[:, cs], k[:, cs], nt,
                                     preferred_element_type=jnp.float32) * scale
            mu = lax.dot_general(qmv[:, cs], kmv[:, cs], nt,
                                 preferred_element_type=jnp.float32)
            logvar = lax.dot_general(qmv[:, vs], kmv[:, vs], nt,
                                     preferred_element_type=jnp.float32)
            # reparameterize: eps * exp(0.5 * logvar) + mu   (eps streamed from HBM)
            p_alpha = eps_ref[0, h] * jnp.exp(0.5 * logvar) + mu
            m = jnp.max(p_alpha, axis=-1, keepdims=True)
            e = jnp.exp(p_alpha - m)
            att = e / jnp.sum(e, axis=-1, keepdims=True)   # exact division keeps 1e-4 parity
            o_parts.append(jnp.dot(att, v[:, cs], preferred_element_type=jnp.float32))
            s_parts.append(scores)
            a_parts.append(att)

        # Assemble lane-dense [TQ, D] slabs (L == dt  =>  n_head*L == D), apply the
        # w_concat projection in-kernel, store each output once as a dense slab.
        wc = wc_ref[...]
        bc = bc_ref[...]

        def concat_project(parts):
            slab = jnp.concatenate(parts, axis=-1)
            return jnp.dot(slab, wc, preferred_element_type=jnp.float32) + bc

        out_ref[0] = concat_project(o_parts).astype(out_ref.dtype)
        attn_ref[0] = concat_project(s_parts).astype(attn_ref.dtype)
        attention_ref[0] = concat_project(a_parts).astype(attention_ref.dtype)
    return kernel


def prob_attention(qp, kp, vp, qmv, kmv, eps, wc_w, wc_b, n_head):
    """Inputs [B,L,D]/[B,L,2D], eps [B,H,L,L]; outputs already w_concat-projected [B,L,D]."""
    B, L, D = qp.shape
    H = n_head
    TQ = _pick_q_tile(L, D, H)

    spec_q = pl.BlockSpec((1, TQ, D), lambda b, qi: (b, qi, 0))
    spec_kv = pl.BlockSpec((1, L, D), lambda b, qi: (b, 0, 0))
    spec_qmv = pl.BlockSpec((1, TQ, 2 * D), lambda b, qi: (b, qi, 0))
    spec_kmv = pl.BlockSpec((1, L, 2 * D), lambda b, qi: (b, 0, 0))
    spec_eps = pl.BlockSpec((1, H, TQ, L), lambda b, qi: (b, 0, qi, 0))
    spec_wc = _const_spec((D, D), lambda b, qi: (0, 0))
    spec_bc = _const_spec((1, D), lambda b, qi: (0, 0))
    spec_out = pl.BlockSpec((1, TQ, D), lambda b, qi: (b, qi, 0))

    return pl.pallas_call(
        _make_prob_attn_kernel(n_head),
        out_shape=tuple(jax.ShapeDtypeStruct((B, L, D), jnp.float32) for _ in range(3)),
        grid=(B, L // TQ),
        in_specs=[spec_q, spec_kv, spec_kv, spec_qmv, spec_kmv, spec_eps, spec_wc, spec_bc],
        out_specs=(spec_out, spec_out, spec_out),
        compiler_params=pltpu.CompilerParams(
            dimension_semantics=("parallel", "parallel"),
            vmem_limit_bytes=_vmem_limit(_attn_vmem_need(TQ, L, D, H))),
    )(qp, kp, vp, qmv, kmv, eps, wc_w, wc_b)


# ------------------------- linear / dot-branch kernels ---------------------- #
# Only used by the dot=True branch (w_concat is fused into the attention kernel).

def _linear_kernel(x_ref, w_ref, b_ref, o_ref):
    o_ref[...] = (jnp.dot(x_ref[...], w_ref[...], preferred_element_type=jnp.float32)
                  + b_ref[...]).astype(o_ref.dtype)


def linear(x, w, b):
    *lead, Din = x.shape
    Dout = w.shape[1]
    M = 1
    for s in lead:
        M *= s
    TM = _pick_row_tile(M, max(Din, Dout))       # conservative working-set estimate
    grid_m = pl.cdiv(M, TM)
    Mp = grid_m * TM
    x2 = x.reshape(M, Din)
    if Mp != M:
        x2 = jnp.pad(x2, ((0, Mp - M), (0, 0)))
    out = pl.pallas_call(
        _linear_kernel,
        out_shape=jax.ShapeDtypeStruct((Mp, Dout), jnp.float32),
        grid=(grid_m,),
        in_specs=[pl.BlockSpec((TM, Din), lambda i: (i, 0)),
                  _const_spec((Din, Dout), lambda i: (0, 0)),
                  _const_spec((1, Dout), lambda i: (0, 0))],
        out_specs=pl.BlockSpec((TM, Dout), lambda i: (i, 0)),
        compiler_params=pltpu.CompilerParams(
            dimension_semantics=("parallel",),
            vmem_limit_bytes=_vmem_limit(
                4 * (Din * Dout + Dout + 2 * TM * (Din + Dout)))),
    )(x2, w, b)
    if Mp != M:
        out = out[:M]
    return out.reshape(*lead, Dout)


def _make_dot_scores_kernel(n_head):
    def kernel(q_ref, k_ref, o_ref):
        q = q_ref[0]
        k = k_ref[0]
        D = q.shape[-1]
        dt = D // n_head
        scale = 1.0 / math.sqrt(dt)
        nt = (((1,), (1,)), ((), ()))
        parts = [lax.dot_general(q[:, h * dt:(h + 1) * dt], k[:, h * dt:(h + 1) * dt],
                                 nt, preferred_element_type=jnp.float32) * scale
                 for h in range(n_head)]
        o_ref[0] = jnp.concatenate(parts, axis=-1).astype(o_ref.dtype)
    return kernel


def dot_scores(qp, kp, n_head):
    B, L, D = qp.shape
    S = n_head * L
    return pl.pallas_call(
        _make_dot_scores_kernel(n_head),
        out_shape=jax.ShapeDtypeStruct((B, L, S), jnp.float32),
        grid=(B,),
        in_specs=[pl.BlockSpec((1, L, D), lambda b: (b, 0, 0)),
                  pl.BlockSpec((1, L, D), lambda b: (b, 0, 0))],
        out_specs=pl.BlockSpec((1, L, S), lambda b: (b, 0, 0)),
        compiler_params=pltpu.CompilerParams(
            dimension_semantics=("parallel",),
            vmem_limit_bytes=_vmem_limit(4 * 2 * (2 * L * D + L * S))),
    )(qp, kp)


# --------------------------- module glue (plain JAX) ------------------------ #

def split_heads(x, n_head):               # used by the plain-JAX reference only
    B, L, D = x.shape
    dt = D // n_head
    return x.reshape(B, L, n_head, dt).transpose(0, 2, 1, 3)


def concat_heads(x):                       # used by the plain-JAX reference only
    B, H, L, dt = x.shape
    return x.transpose(0, 2, 1, 3).reshape(B, L, H * dt)


def init_params(key, d_model, n_layer):
    ks = jax.random.split(key, 12)

    def w(k):
        return jax.random.normal(k, (d_model, d_model), jnp.float32) * 0.05

    def b(k):
        return jax.random.normal(k, (1, d_model), jnp.float32) * 0.05

    return {
        "w_q_w": w(ks[0]), "w_q_b": b(ks[1]),
        "w_k_w": w(ks[2]), "w_k_b": b(ks[3]),
        "w_v_w": w(ks[4]), "w_v_b": b(ks[5]),
        "w_concat_w": w(ks[6]), "w_concat_b": b(ks[7]),
        "qk_mu_w": jnp.stack([w(k) for k in jax.random.split(ks[8], n_layer)]),
        "qk_mu_b": jnp.stack([b(k) for k in jax.random.split(ks[9], n_layer)]),
        "qk_var_w": jnp.stack([w(k) for k in jax.random.split(ks[10], n_layer)]),
        "qk_var_b": jnp.stack([b(k) for k in jax.random.split(ks[11], n_layer)]),
    }


def prob_mha_forward(params, n_head, aq, ak, av, eps,
                     mask=None, dot=None, prior_attn=None, pprior_attn=None):
    """eps: [B, n_head, L, L] standard-normal draws (explicit input, see header note).
    Returns (out, attn, attention) like the reference module (or concat(attn) if dot)."""
    # TODO(synk): the reference also re-projects undefined `q, k, v` (broken line); omitted.
    if dot:
        # dot branch of the reference: concat(scaled scores), no w_concat applied.
        qp = linear(aq, params["w_q_w"], params["w_q_b"])
        kp = linear(ak, params["w_k_w"], params["w_k_b"])
        return dot_scores(qp, kp, n_head)

    qp, kp, vp, qmv, kmv = fused_qkv_muvar(aq, ak, av, params)
    B, L, D = qp.shape
    assert L == D // n_head, "reference requires length == d_model // n_head"

    out, attn, attention = prob_attention(
        qp, kp, vp, qmv, kmv, eps,
        params["w_concat_w"], params["w_concat_b"], n_head)

    if prior_attn is not None and pprior_attn is not None:
        attention = attention + pprior_attn
        attn = attn + prior_attn
    return out, attn, attention


# ------------------------------- reference --------------------------------- #

def _ref_forward(params, n_head, aq, ak, av, eps):
    def lin(x, w, b):
        return x @ w + b
    aq_p = lin(aq, params["w_q_w"], params["w_q_b"])
    ak_p = lin(ak, params["w_k_w"], params["w_k_b"])
    av_p = lin(av, params["w_v_w"], params["w_v_b"])
    q_mu = lin(aq_p, params["qk_mu_w"][0], params["qk_mu_b"][0])
    k_mu = lin(ak_p, params["qk_mu_w"][0], params["qk_mu_b"][0])
    q_var = lin(aq_p, params["qk_var_w"][0], params["qk_var_b"][0])
    k_var = lin(ak_p, params["qk_var_w"][0], params["qk_var_b"][0])
    qh, kh, vh = (split_heads(t, n_head) for t in (aq_p, ak_p, av_p))
    qmu_h, kmu_h = split_heads(q_mu, n_head), split_heads(k_mu, n_head)
    qvar_h, kvar_h = split_heads(q_var, n_head), split_heads(k_var, n_head)
    dt = qh.shape[-1]
    attn = jnp.einsum("bhqd,bhkd->bhqk", qh, kh) / math.sqrt(dt)
    mu = jnp.einsum("bhqd,bhkd->bhqk", qmu_h, kmu_h)
    logvar = jnp.einsum("bhqd,bhkd->bhqk", qvar_h, kvar_h)
    p_alpha = eps * jnp.exp(0.5 * logvar) + mu
    attention = jax.nn.softmax(p_alpha, axis=-1)
    out_h = jnp.einsum("bhqk,bhkd->bhqd", attention, vh)
    wc, bc = params["w_concat_w"], params["w_concat_b"]
    return (lin(concat_heads(out_h), wc, bc),
            lin(concat_heads(attn), wc, bc),
            lin(concat_heads(attention), wc, bc),
            concat_heads(attn))          # last: un-projected scores for the dot branch


# ---------------------------------- main ------------------------------------ #

if __name__ == "__main__":
    d_model, n_head, n_layer = 32, 4, 2
    B, L = 2, d_model // n_head            # L must equal d_model // n_head (= 8)

    root = jax.random.PRNGKey(0)
    k_params, k_q, k_k, k_v, k_eps = jax.random.split(root, 5)
    params = init_params(k_params, d_model, n_layer)

    aq = jax.random.normal(k_q, (B, L, d_model), jnp.float32)
    ak = jax.random.normal(k_k, (B, L, d_model), jnp.float32)
    av = jax.random.normal(k_v, (B, L, d_model), jnp.float32)
    eps = jax.random.normal(k_eps, (B, n_head, L, L), jnp.float32)

    out, attn, attention = prob_mha_forward(params, n_head, aq, ak, av, eps)
    attn_dot = prob_mha_forward(params, n_head, aq, ak, av, eps, dot=True)
    jax.block_until_ready((out, attn, attention, attn_dot))

    # correctness check against a plain-JAX reference using the same eps input
    r_out, r_attn, r_attention, r_dot = _ref_forward(params, n_head, aq, ak, av, eps)
    assert jnp.allclose(out, r_out, atol=1e-4, rtol=1e-4)
    assert jnp.allclose(attn, r_attn, atol=1e-4, rtol=1e-4)
    assert jnp.allclose(attention, r_attention, atol=1e-4, rtol=1e-4)
    assert jnp.allclose(attn_dot, r_dot, atol=1e-4, rtol=1e-4)

    print("KERNEL_OK")
</pallas_src>

<mosaic_0001>
module attributes {stable_mosaic.version = 11 : i64} {
  func.func @_fused_proj_kernel(%arg0: i32, %arg1: memref<16x32xf32, #tpu.memory_space<vmem>>, %arg2: memref<16x32xf32, #tpu.memory_space<vmem>>, %arg3: memref<16x32xf32, #tpu.memory_space<vmem>>, %arg4: memref<32x32xf32, #tpu.memory_space<vmem>>, %arg5: memref<1x32xf32, #tpu.memory_space<vmem>>, %arg6: memref<32x32xf32, #tpu.memory_space<vmem>>, %arg7: memref<1x32xf32, #tpu.memory_space<vmem>>, %arg8: memref<32x32xf32, #tpu.memory_space<vmem>>, %arg9: memref<1x32xf32, #tpu.memory_space<vmem>>, %arg10: memref<32x64xf32, #tpu.memory_space<vmem>>, %arg11: memref<1x64xf32, #tpu.memory_space<vmem>>, %arg12: memref<16x32xf32, #tpu.memory_space<vmem>>, %arg13: memref<16x32xf32, #tpu.memory_space<vmem>>, %arg14: memref<16x32xf32, #tpu.memory_space<vmem>>, %arg15: memref<16x64xf32, #tpu.memory_space<vmem>>, %arg16: memref<16x64xf32, #tpu.memory_space<vmem>>) attributes {dimension_semantics = [#tpu.dimension_semantics<parallel>], iteration_bounds = array<i64: 1>, scalar_prefetch = 0 : i64, scratch_operands = 0 : i64, tpu.core_type = #tpu.core_type<tc>, window_params = [{transform_indices = @transform_0, window_bounds = array<i64: 16, 32>}, {transform_indices = @transform_1, window_bounds = array<i64: 16, 32>}, {transform_indices = @transform_2, window_bounds = array<i64: 16, 32>}, {pipeline_mode = #tpu.pipeline_mode<synchronous>, transform_indices = @transform_3, window_bounds = array<i64: 32, 32>}, {pipeline_mode = #tpu.pipeline_mode<synchronous>, transform_indices = @transform_4, window_bounds = array<i64: 1, 32>}, {pipeline_mode = #tpu.pipeline_mode<synchronous>, transform_indices = @transform_5, window_bounds = array<i64: 32, 32>}, {pipeline_mode = #tpu.pipeline_mode<synchronous>, transform_indices = @transform_6, window_bounds = array<i64: 1, 32>}, {pipeline_mode = #tpu.pipeline_mode<synchronous>, transform_indices = @transform_7, window_bounds = array<i64: 32, 32>}, {pipeline_mode = #tpu.pipeline_mode<synchronous>, transform_indices = @transform_8, window_bounds = array<i64: 1, 32>}, {pipeline_mode = #tpu.pipeline_mode<synchronous>, transform_indices = @transform_9, window_bounds = array<i64: 32, 64>}, {pipeline_mode = #tpu.pipeline_mode<synchronous>, transform_indices = @transform_10, window_bounds = array<i64: 1, 64>}, {transform_indices = @transform_11, window_bounds = array<i64: 16, 32>}, {transform_indices = @transform_12, window_bounds = array<i64: 16, 32>}, {transform_indices = @transform_13, window_bounds = array<i64: 16, 32>}, {transform_indices = @transform_14, window_bounds = array<i64: 16, 64>}, {transform_indices = @transform_15, window_bounds = array<i64: 16, 64>}]} {
    %c0 = arith.constant 0 : index
    %c0_0 = arith.constant 0 : index
    %0 = vector.load %arg1[%c0, %c0_0] : memref<16x32xf32, #tpu.memory_space<vmem>>, vector<16x32xf32>
    %c0_1 = arith.constant 0 : index
    %c0_2 = arith.constant 0 : index
    %1 = vector.load %arg4[%c0_1, %c0_2] : memref<32x32xf32, #tpu.memory_space<vmem>>, vector<32x32xf32>
    %cst = arith.constant dense<0.000000e+00> : vector<16x32xf32>
    %2 = tpu.matmul %0, %1, %cst {dimension_numbers = #tpu.dot_dimension_numbers<[1], [0], [0], [1], [0, 0, 1, 1], [], []>} : vector<16x32xf32>, vector<32x32xf32>, vector<16x32xf32> -> vector<16x32xf32>
    %c0_3 = arith.constant 0 : index
    %c0_4 = arith.constant 0 : index
    %3 = vector.load %arg5[%c0_3, %c0_4] : memref<1x32xf32, #tpu.memory_space<vmem>>, vector<1x32xf32>
    %4 = vector.broadcast %3 : vector<1x32xf32> to vector<16x32xf32>
    %5 = arith.addf %2, %4 : vector<16x32xf32>
    %c0_5 = arith.constant 0 : index
    %c0_6 = arith.constant 0 : index
    %6 = vector.load %arg2[%c0_5, %c0_6] : memref<16x32xf32, #tpu.memory_space<vmem>>, vector<16x32xf32>
    %c0_7 = arith.constant 0 : index
    %c0_8 = arith.constant 0 : index
    %7 = vector.load %arg6[%c0_7, %c0_8] : memref<32x32xf32, #tpu.memory_space<vmem>>, vector<32x32xf32>
    %cst_9 = arith.constant dense<0.000000e+00> : vector<16x32xf32>
    %8 = tpu.matmul %6, %7, %cst_9 {dimension_numbers = #tpu.dot_dimension_numbers<[1], [0], [0], [1], [0, 0, 1, 1], [], []>} : vector<16x32xf32>, vector<32x32xf32>, vector<16x32xf32> -> vector<16x32xf32>
    %c0_10 = arith.constant 0 : index
    %c0_11 = arith.constant 0 : index
    %9 = vector.load %arg7[%c0_10, %c0_11] : memref<1x32xf32, #tpu.memory_space<vmem>>, vector<1x32xf32>
    %10 = vector.broadcast %9 : vector<1x32xf32> to vector<16x32xf32>
    %11 = arith.addf %8, %10 : vector<16x32xf32>
    %c0_12 = arith.constant 0 : index
    %c0_13 = arith.constant 0 : index
    %12 = vector.load %arg3[%c0_12, %c0_13] : memref<16x32xf32, #tpu.memory_space<vmem>>, vector<16x32xf32>
    %c0_14 = arith.constant 0 : index
    %c0_15 = arith.constant 0 : index
    %13 = vector.load %arg8[%c0_14, %c0_15] : memref<32x32xf32, #tpu.memory_space<vmem>>, vector<32x32xf32>
    %cst_16 = arith.constant dense<0.000000e+00> : vector<16x32xf32>
    %14 = tpu.matmul %12, %13, %cst_16 {dimension_numbers = #tpu.dot_dimension_numbers<[1], [0], [0], [1], [0, 0, 1, 1], [], []>} : vector<16x32xf32>, vector<32x32xf32>, vector<16x32xf32> -> vector<16x32xf32>
    %c0_17 = arith.constant 0 : index
    %c0_18 = arith.constant 0 : index
    %15 = vector.load %arg9[%c0_17, %c0_18] : memref<1x32xf32, #tpu.memory_space<vmem>>, vector<1x32xf32>
    %16 = vector.broadcast %15 : vector<1x32xf32> to vector<16x32xf32>
    %17 = arith.addf %14, %16 : vector<16x32xf32>
    %c0_19 = arith.constant 0 : index
    %c0_20 = arith.constant 0 : index
    %18 = vector.load %arg12[%c0_19, %c0_20] : memref<16x32xf32, #tpu.memory_space<vmem>>, vector<16x32xf32>
    tpu.vector_store %arg12[%c0_19, %c0_20], %5 {strides = array<i32>} : memref<16x32xf32, #tpu.memory_space<vmem>>, vector<16x32xf32>,
    %c0_21 = arith.constant 0 : index
    %c0_22 = arith.constant 0 : index
    %19 = vector.load %arg13[%c0_21, %c0_22] : memref<16x32xf32, #tpu.memory_space<vmem>>, vector<16x32xf32>
    tpu.vector_store %arg13[%c0_21, %c0_22], %11 {strides = array<i32>} : memref<16x32xf32, #tpu.memory_space<vmem>>, vector<16x32xf32>,
    %c0_23 = arith.constant 0 : index
    %c0_24 = arith.constant 0 : index
    %20 = vector.load %arg14[%c0_23, %c0_24] : memref<16x32xf32, #tpu.memory_space<vmem>>, vector<16x32xf32>
    tpu.vector_store %arg14[%c0_23, %c0_24], %17 {strides = array<i32>} : memref<16x32xf32, #tpu.memory_space<vmem>>, vector<16x32xf32>,
    %c0_25 = arith.constant 0 : index
    %c0_26 = arith.constant 0 : index
    %21 = vector.load %arg10[%c0_25, %c0_26] : memref<32x64xf32, #tpu.memory_space<vmem>>, vector<32x64xf32>
    %c0_27 = arith.constant 0 : index
    %c0_28 = arith.constant 0 : index
    %22 = vector.load %arg11[%c0_27, %c0_28] : memref<1x64xf32, #tpu.memory_space<vmem>>, vector<1x64xf32>
    %cst_29 = arith.constant dense<0.000000e+00> : vector<16x64xf32>
    %23 = tpu.matmul %5, %21, %cst_29 {dimension_numbers = #tpu.dot_dimension_numbers<[1], [0], [0], [1], [0, 0, 1, 1], [], []>} : vector<16x32xf32>, vector<32x64xf32>, vector<16x64xf32> -> vector<16x64xf32>
    %24 = vector.broadcast %22 : vector<1x64xf32> to vector<16x64xf32>
    %25 = arith.addf %23, %24 : vector<16x64xf32>
    %c0_30 = arith.constant 0 : index
    %c0_31 = arith.constant 0 : index
    %26 = vector.load %arg15[%c0_30, %c0_31] : memref<16x64xf32, #tpu.memory_space<vmem>>, vector<16x64xf32>
    tpu.vector_store %arg15[%c0_30, %c0_31], %25 {strides = array<i32>} : memref<16x64xf32, #tpu.memory_space<vmem>>, vector<16x64xf32>,
    %cst_32 = arith.constant dense<0.000000e+00> : vector<16x64xf32>
    %27 = tpu.matmul %11, %21, %cst_32 {dimension_numbers = #tpu.dot_dimension_numbers<[1], [0], [0], [1], [0, 0, 1, 1], [], []>} : vector<16x32xf32>, vector<32x64xf32>, vector<16x64xf32> -> vector<16x64xf32>
    %28 = vector.broadcast %22 : vector<1x64xf32> to vector<16x64xf32>
    %29 = arith.addf %27, %28 : vector<16x64xf32>
    %c0_33 = arith.constant 0 : index
    %c0_34 = arith.constant 0 : index
    %30 = vector.load %arg16[%c0_33, %c0_34] : memref<16x64xf32, #tpu.memory_space<vmem>>, vector<16x64xf32>
    tpu.vector_store %arg16[%c0_33, %c0_34], %29 {strides = array<i32>} : memref<16x64xf32, #tpu.memory_space<vmem>>, vector<16x64xf32>,
    return
  }
  func.func @transform_0(%arg0: i32) -> (i32, i32) {
    %c0_i32 = arith.constant 0 : i32
    %c0_i32_0 = arith.constant 0 : i32
    return %arg0, %c0_i32 : i32, i32
  }
  func.func @transform_1(%arg0: i32) -> (i32, i32) {
    %c0_i32 = arith.constant 0 : i32
    %c0_i32_0 = arith.constant 0 : i32
    return %arg0, %c0_i32 : i32, i32
  }
  func.func @transform_2(%arg0: i32) -> (i32, i32) {
    %c0_i32 = arith.constant 0 : i32
    %c0_i32_0 = arith.constant 0 : i32
    return %arg0, %c0_i32 : i32, i32
  }
  func.func @transform_3(%arg0: i32) -> (i32, i32) {
    %c0_i32 = arith.constant 0 : i32
    %c0_i32_0 = arith.constant 0 : i32
    %c0_i32_1 = arith.constant 0 : i32
    return %c0_i32, %c0_i32_0 : i32, i32
  }
  func.func @transform_4(%arg0: i32) -> (i32, i32) {
    %c0_i32 = arith.constant 0 : i32
    %c0_i32_0 = arith.constant 0 : i32
    %c0_i32_1 = arith.constant 0 : i32
    return %c0_i32, %c0_i32_0 : i32, i32
  }
  func.func @transform_5(%arg0: i32) -> (i32, i32) {
    %c0_i32 = arith.constant 0 : i32
    %c0_i32_0 = arith.constant 0 : i32
    %c0_i32_1 = arith.constant 0 : i32
    return %c0_i32, %c0_i32_0 : i32, i32
  }
  func.func @transform_6(%arg0: i32) -> (i32, i32) {
    %c0_i32 = arith.constant 0 : i32
    %c0_i32_0 = arith.constant 0 : i32
    %c0_i32_1 = arith.constant 0 : i32
    return %c0_i32, %c0_i32_0 : i32, i32
  }
  func.func @transform_7(%arg0: i32) -> (i32, i32) {
    %c0_i32 = arith.constant 0 : i32
    %c0_i32_0 = arith.constant 0 : i32
    %c0_i32_1 = arith.constant 0 : i32
    return %c0_i32, %c0_i32_0 : i32, i32
  }
  func.func @transform_8(%arg0: i32) -> (i32, i32) {
    %c0_i32 = arith.constant 0 : i32
    %c0_i32_0 = arith.constant 0 : i32
    %c0_i32_1 = arith.constant 0 : i32
    return %c0_i32, %c0_i32_0 : i32, i32
  }
  func.func @transform_9(%arg0: i32) -> (i32, i32) {
    %c0_i32 = arith.constant 0 : i32
    %c0_i32_0 = arith.constant 0 : i32
    %c0_i32_1 = arith.constant 0 : i32
    return %c0_i32, %c0_i32_0 : i32, i32
  }
  func.func @transform_10(%arg0: i32) -> (i32, i32) {
    %c0_i32 = arith.constant 0 : i32
    %c0_i32_0 = arith.constant 0 : i32
    %c0_i32_1 = arith.constant 0 : i32
    return %c0_i32, %c0_i32_0 : i32, i32
  }
  func.func @transform_11(%arg0: i32) -> (i32, i32) {
    %c0_i32 = arith.constant 0 : i32
    %c0_i32_0 = arith.constant 0 : i32
    return %arg0, %c0_i32 : i32, i32
  }
  func.func @transform_12(%arg0: i32) -> (i32, i32) {
    %c0_i32 = arith.constant 0 : i32
    %c0_i32_0 = arith.constant 0 : i32
    return %arg0, %c0_i32 : i32, i32
  }
  func.func @transform_13(%arg0: i32) -> (i32, i32) {
    %c0_i32 = arith.constant 0 : i32
    %c0_i32_0 = arith.constant 0 : i32
    return %arg0, %c0_i32 : i32, i32
  }
  func.func @transform_14(%arg0: i32) -> (i32, i32) {
    %c0_i32 = arith.constant 0 : i32
    %c0_i32_0 = arith.constant 0 : i32
    return %arg0, %c0_i32 : i32, i32
  }
  func.func @transform_15(%arg0: i32) -> (i32, i32) {
    %c0_i32 = arith.constant 0 : i32
    %c0_i32_0 = arith.constant 0 : i32
    return %arg0, %c0_i32 : i32, i32
  }
}

</mosaic_0001>

<bundles_post_ra>
// kernel: tpu_custom_call.1
= control target key start
LH: loop header
LB: loop body
LE: loop exit
PB: predicated region body
PF: predicated region fallthrough
CT: control target
= control target key end

     0   :  { %21 = vsyncpa [#allocation3], 0  ;;  %s974_s0 = inlined_call_operand.hbm [shape: f32[16,32], index: 0, kind: input, shape index: {}]   ;;  %s975_s1 = inlined_call_operand.hbm [shape: f32[16,32], index: 1, kind: input, shape index: {}]   ;;  %s976_s2 = inlined_call_operand.hbm [shape: f32[16,32], index: 2, kind: input, shape index: {}]   ;;  %s977_s3 = inlined_call_operand.hbm [shape: f32[32,32], index: 3, kind: input, shape index: {}]   ;;  %s978_s4 = inlined_call_operand.vmem [shape: f32[1,32], index: 4, kind: input, shape index: {}]   ;;  %s979_s5 = inlined_call_operand.hbm [shape: f32[32,32], index: 5, kind: input, shape index: {}]   ;;  %s980_s6 = inlined_call_operand.vmem [shape: f32[1,32], index: 6, kind: input, shape index: {}]   ;;  %s981_s7 = inlined_call_operand.hbm [shape: f32[32,32], index: 7, kind: input, shape index: {}]   ;;  %s982_s8 = inlined_call_operand.vmem [shape: f32[1,32], index: 8, kind: input, shape index: {}]   ;;  %s983_s9 = inlined_call_operand.hbm [shape: f32[32,64], index: 9, kind: input, shape index: {}]   ;;  %s984_s10 = inlined_call_operand.vmem [shape: f32[1,64], index: 10, kind: input, shape index: {}]   ;;  %s985_s11 = inlined_call_operand.hbm [shape: f32[16,32], index: 11, kind: output, shape index: {0}]   ;;  %s986_s12 = inlined_call_operand.hbm [shape: f32[16,32], index: 12, kind: output, shape index: {1}]   ;;  %s987_s13 = inlined_call_operand.hbm [shape: f32[16,32], index: 13, kind: output, shape index: {2}]   ;;  %s988_s14 = inlined_call_operand.hbm [shape: f32[16,64], index: 14, kind: output, shape index: {3}]   ;;  %s989_s15 = inlined_call_operand.hbm [shape: f32[16,64], index: 15, kind: output, shape index: {4}]  }
   0x1   :  { %22 = vsyncpa [#allocation6], 0 }
   0x2   :  { %23 = vsyncpa [#allocation9], 0 }
   0x3   :  { %24 = vsyncpa [#allocation12], 0 }
   0x4   :  { %25 = vsyncpa [#allocation4], 0 }
   0x5   :  { %26 = vsyncpa [#allocation16], 0 }
   0x6   :  { %27 = vsyncpa [#allocation19], 0  ;;  %s45_s20 = sshll.u32 %s975_s1, 4  ;;  %s776_s21 = smov [#allocation5]   ;;  %s46_s20 = int_to_ptr.hbm [resolvable:$true] %s45_s20 }
   0x7   :  { %s47_s22 = sshll.u32 %s776_s21, 4  ;;  %s71_s25 = sshll.u32 %s977_s3, 4  ;;  %s48_s22 = int_to_ptr.vmem [resolvable:$true] %s47_s22  ;;  %s72_s25 = int_to_ptr.hbm [resolvable:$true] %s71_s25 }
   0x8   :  { %s777_s26 = smov 128   ;;  %s778_s27 = smov 8  }
   0x9   :  { %53 = dma.hbm_to_vmem [thread:$0]  %s46_s20, 256, %s48_s22, [#allocation6], %s777_s26, %s777_s26, %s778_s27  }
   0xa   :  { %s779_s28 = smov [#allocation8]   ;;  %s101_s1 = sshll.u32 %s981_s7, 4  ;;  %s102_s1 = int_to_ptr.hbm [resolvable:$true] %s101_s1 }
   0xb   :  { %s73_s29 = sshll.u32 %s779_s28, 4  ;;  %s32_s18 = sshll.u32 %s974_s0, 4  ;;  %s74_s29 = int_to_ptr.vmem [resolvable:$true] %s73_s29  ;;  %s33_s18 = int_to_ptr.hbm [resolvable:$true] %s32_s18 }
   0xc   :  { %79 = dma.hbm_to_vmem [thread:$0]  %s72_s25, 512, %s74_s29, [#allocation9], %s777_s26, %s777_s26, %s778_s27  }
   0xd   :  { %s780_s19 = smov [#allocation11]   ;;  %s781_s20 = smov [#allocation2]  }
   0xe   :  { %s103_s21 = sshll.u32 %s780_s19, 4  ;;  %s34_s7 = sshll.u32 %s781_s20, 4  ;;  %s104_s21 = int_to_ptr.vmem [resolvable:$true] %s103_s21  ;;  %s35_s7 = int_to_ptr.vmem [resolvable:$true] %s34_s7 }
   0xf   :  { %109 = dma.hbm_to_vmem [thread:$0]  %s102_s1, 512, %s104_s21, [#allocation12], %s777_s26, %s777_s26, %s778_s27  }
  0x10   :  { %s58_s24 = sshll.u32 %s976_s2, 4  ;;  %s86_s28 = sshll.u32 %s979_s5, 4  ;;  %s59_s24 = int_to_ptr.hbm [resolvable:$true] %s58_s24  ;;  %s87_s28 = int_to_ptr.hbm [resolvable:$true] %s86_s28 }
  0x11   :  { %40 = dma.hbm_to_vmem [thread:$0]  %s33_s18, 256, %s35_s7, [#allocation3], %s777_s26, %s777_s26, %s778_s27  }
  0x12   :  { %s782_s29 = smov [#allocation7]   ;;  %s783_s16 = smov [#allocation10]  }
  0x13   :  { %s60_s30 = sshll.u32 %s782_s29, 4  ;;  %s88_s2 = sshll.u32 %s783_s16, 4  ;;  %s61_s30 = int_to_ptr.vmem [resolvable:$true] %s60_s30  ;;  %s89_s2 = int_to_ptr.vmem [resolvable:$true] %s88_s2 }
  0x14   :  { %66 = dma.hbm_to_vmem [thread:$0]  %s59_s24, 256, %s61_s30, [#allocation6], %s777_s26, %s777_s26, %s778_s27  }
  0x15   :  { %s116_s17 = sshll.u32 %s983_s9, 4  ;;  %s784_s5 = smov [#allocation13]   ;;  %s117_s17 = int_to_ptr.hbm [resolvable:$true] %s116_s17 }
  0x16   :  { %94 = dma.hbm_to_vmem [thread:$0]  %s87_s28, 512, %s89_s2, [#allocation9], %s777_s26, %s777_s26, %s778_s27  }
  0x17   :  { %s118_s18 = sshll.u32 %s784_s5, 4  ;;  %s119_s18 = int_to_ptr.vmem [resolvable:$true] %s118_s18 }
  0x18   :  { %124 = dma.hbm_to_vmem [thread:$0]  %s117_s17, 512, %s119_s18, [#allocation12], %s777_s26, %s777_s26, %s778_s27  }
  0x19   :  { %762 = dma.done.wait [#allocation3], 256  }
  0x1a   :  { %763 = vsyncadd [#allocation3], 4294967040 }
  0x1b   :  { %764 = dma.done.wait [#allocation6], 512  }
  0x1c   :  { %765 = vsyncadd [#allocation6], 4294966784 }
  0x1d   :  { %766 = dma.done.wait [#allocation9], 1024  }
  0x1e   :  { %767 = vsyncadd [#allocation9], 4294966272 }
  0x1f   :  { %768 = dma.done.wait [#allocation12], 1024  }
  0x20   :  { %769 = vsyncadd [#allocation12], 4294966272  ;;  %v160_v0 = vld [vmem:[#allocation8 + $0x18] sm:$0xff]  ;;  %v159_v1 = vld [vmem:[#allocation8 + $0x10] sm:$0xff]  ;;  %vm165_vm0 = vcmask 261120   ;;  %s369_s24 = sshll.u32 %s986_s12, 4  ;;  %s370_s24 = int_to_ptr.hbm [resolvable:$true] %s369_s24 }
  0x21   :  { %184 = vmatpush.msra.mxu0 %v160_v0  ;;  %452 = vmatpush.msra.mxu1 %v160_v0  ;;  %v158_v2 = vld [vmem:[#allocation8 + $0x8] sm:$0xff]  ;;  %v157_v3 = vld [vmem:[#allocation8] sm:$0xff]  ;;  %v155_v4 = vld [vmem:[#allocation2] sm:$0xff]  ;;  %s356_s25 = sshll.u32 %s985_s11, 4  ;;  %s786_s28 = smov [#allocation14]   ;;  %vm316_vm1 = vcmask 523264   ;;  %s357_s25 = int_to_ptr.hbm [resolvable:$true] %s356_s25 }
  0x22   :  { %v156_v5 = vld [vmem:[#allocation2 + $0x8] sm:$0xff]  ;;  %v281_v9 = vld [vmem:[#allocation13 + $0x10] sm:$0xff]  ;;  %v198_v11 = vld [vmem:[#allocation10 + $0x8] sm:$0xff]  ;;  %s354_s29 = sshll.u32 %s786_s28, 4  ;;  %s787_s16 = smov [#allocation17]   ;;  %s355_s29 = int_to_ptr.vmem [resolvable:$true] %s354_s29 }
  0x23   :  { %185 = vmatpush.msra.mxu0 %v159_v1  ;;  %453 = vmatpush.msra.mxu1 %v159_v1  ;;  %v282_v6 = vld [vmem:[#allocation13 + $0x18] sm:$0xff]  ;;  %v199_v10 = vld [vmem:[#allocation10 + $0x10] sm:$0xff]  ;;  %v197_v12 = vld [vmem:[#allocation10] sm:$0xff]  ;;  %s380_s2 = sshll.u32 %s787_s16, 4  ;;  %s382_s3 = sshll.u32 %s987_s13, 4  ;;  %s381_s2 = int_to_ptr.vmem [resolvable:$true] %s380_s2  ;;  %s383_s3 = int_to_ptr.hbm [resolvable:$true] %s382_s3 }
  0x24   :  { %v239_v7 = vld [vmem:[#allocation11 + $0x18] sm:$0xff]  ;;  %305 = vmatpush.msra.mxu3 %v282_v6  ;;  %v195_v13 = vld [vmem:[#allocation5] sm:$0xff]  ;;  %v196_v14 = vld [vmem:[#allocation5 + $0x8] sm:$0xff]  ;;  %s788_s13 = smov [#allocation18]   ;;  %s395_s19 = sshll.u32 %s988_s14, 4  ;;  %s396_s19 = int_to_ptr.hbm [resolvable:$true] %s395_s19 }
  0x25   :  { %186 = vmatpush.msra.mxu0 %v158_v2  ;;  %454 = vmatpush.msra.mxu1 %v158_v2  ;;  %v200_v8 = vld [vmem:[#allocation10 + $0x18] sm:$0xff]  ;;  %v238_v15 = vld [vmem:[#allocation11 + $0x10] sm:$0xff]  ;;  %v280_v16 = vld [vmem:[#allocation13 + $0x8] sm:$0xff]  ;;  %s393_s5 = sshll.u32 %s788_s13, 4  ;;  %s789_s21 = smov [#allocation20]   ;;  %s394_s5 = int_to_ptr.vmem [resolvable:$true] %s393_s5 }
  0x26   :  { %262 = vmatpush.msra.mxu2 %v239_v7  ;;  %306 = vmatpush.msra.mxu3 %v281_v9  ;;  %v237_v17 = vld [vmem:[#allocation11 + $0x8] sm:$0xff]  ;;  %v279_v18 = vld [vmem:[#allocation13] sm:$0xff]  ;;  %v234_v20 = vld [vmem:[#allocation7] sm:$0xff]  ;;  %s406_s20 = sshll.u32 %s789_s21, 4  ;;  %s407_s20 = int_to_ptr.vmem [resolvable:$true] %s406_s20 }
  0x27   :  { %187 = vmatpush.msra.mxu0 %v157_v3  ;;  %455 = vmatpush.msra.mxu1 %v157_v3  ;;  %v236_v19 = vld [vmem:[#allocation11] sm:$0xff]  ;;  %v235_v21 = vld [vmem:[#allocation7 + $0x8] sm:$0xff]  ;;  %v470_v22 = vld [vmem:[%s978_s4] ss:$0 sm:$0xff]  ;;  %s785_s4 = smov [#allocation15]  }
  0x28   :  { %442 = vmatmul.msk.f32.vlgmr.msra.gmra.mxu0 %vm165_vm0, %v155_v4  ;;  %443 = vmatmul.msk.f32.vlgmr.msra.gmra.mxu1 %vm165_vm0, %v156_v5  ;;  %v471_v27 = vld [vmem:[%s980_s6] ss:$0 sm:$0xff]  ;;  %s367_s7 = sshll.u32 %s785_s4, 4  ;;  %s368_s7 = int_to_ptr.vmem [resolvable:$true] %s367_s7 }
  0x29   :  { %223 = vmatpush.msrb.mxu1 %v200_v8  ;;  %337 = vmatpush.msrb.mxu0 %v282_v6  ;;  %v473_v32 = vld [vmem:[%s982_s8] ss:$0 sm:$0xff] }
  0x2a   :  { %263 = vmatpush.msra.mxu2 %v238_v15  ;;  %307 = vmatpush.msra.mxu3 %v280_v16  ;;  %v472_v37 = vld [vmem:[%s984_s10] ss:$0 sm:$0xff] }
  0x2b   :  { %224 = vmatpush.msrb.mxu1 %v199_v10  ;;  %338 = vmatpush.msrb.mxu0 %v281_v9 }
  0x2c   :  { %264 = vmatpush.msra.mxu2 %v237_v17  ;;  %308 = vmatpush.msra.mxu3 %v279_v18 }
  0x2d   :  { %225 = vmatpush.msrb.mxu1 %v198_v11  ;;  %339 = vmatpush.msrb.mxu0 %v280_v16 }
  0x2e   :  { %265 = vmatpush.msra.mxu2 %v236_v19 }
  0x2f   :  { %226 = vmatpush.msrb.mxu1 %v197_v12  ;;  %340 = vmatpush.msrb.mxu0 %v279_v18 }
  0x30   :  { %444 = vmatmul.msk.f32.vlgmr.msrb.gmra.mxu1 %vm165_vm0, %v195_v13  ;;  %446 = vmatmul.msk.f32.vlgmr.msra.gmra.mxu2 %vm165_vm0, %v234_v20 }
  0x38   :  { %445 = vmatmul.msk.f32.gmra.mxu1 %vm165_vm0, %v196_v14  ;;  %447 = vmatmul.msk.f32.gmra.mxu2 %vm165_vm0, %v235_v21 }
  0xa5   :  { %v189_v23 = vpop.f32.mrf.mxu0  ;;  %v192_v24 = vpop.f32.mrf.mxu1 }
  0xa6   :  { %v190_v25 = vadd.f32 %v470_v22, %v189_v23  ;;  %v193_v26 = vadd.f32 %v470_v22, %v192_v24 }
  0xa8   :  { %273 = vst.msk [vmem:[#allocation14] sm:$0xff] %vm165_vm0, %v190_v25  ;;  %448 = vmatmul.msk.f32.vlgmr.msra.gmra.mxu3 %vm165_vm0, %v190_v25 }
  0xa9   :  { %274 = vst.msk [vmem:[#allocation14 + $0x8] sm:$0xff] %vm165_vm0, %v193_v26 }
  0xaa   :  { %362 = dma.vmem_to_hbm [thread:$0]  %s355_s29, 256, %s357_s25, [#allocation4], %s777_s26, %s777_s26, %s778_s27  }
  0xad   :  { %v228_v28 = vpop.f32.mrf.mxu1 }
  0xae   :  { %v229_v29 = vadd.f32 %v471_v27, %v228_v28 }
  0xb0   :  { %275 = vst.msk [vmem:[#allocation15] sm:$0xff] %vm165_vm0, %v229_v29  ;;  %449 = vmatmul.msk.f32.gmra.mxu3 %vm165_vm0, %v193_v26  ;;  %450 = vmatmul.msk.f32.vlgmr.msrb.gmra.mxu0 %vm165_vm0, %v229_v29 }
  0xb3   :  { %v267_v33 = vpop.f32.mrf.mxu2 }
  0xb4   :  { %v268_v34 = vadd.f32 %v473_v32, %v267_v33 }
  0xb5   :  { %v231_v30 = vpop.f32.mrf.mxu1 }
  0xb6   :  { %v232_v31 = vadd.f32 %v471_v27, %v231_v30  ;;  %277 = vst.msk [vmem:[#allocation17] sm:$0xff] %vm165_vm0, %v268_v34 }
  0xb8   :  { %276 = vst.msk [vmem:[#allocation15 + $0x8] sm:$0xff] %vm165_vm0, %v232_v31  ;;  %451 = vmatmul.msk.f32.gmra.mxu0 %vm165_vm0, %v232_v31 }
  0xb9   :  { %375 = dma.vmem_to_hbm [thread:$0]  %s368_s7, 256, %s370_s24, [#allocation16], %s777_s26, %s777_s26, %s778_s27  }
  0xba   :  { %s408_s7 = sshll.u32 %s989_s15, 4  ;;  %s409_s7 = int_to_ptr.hbm [resolvable:$true] %s408_s7 }
  0xbb   :  { %v270_v35 = vpop.f32.mrf.mxu2 }
  0xbc   :  { %v271_v36 = vadd.f32 %v473_v32, %v270_v35 }
  0xbe   :  { %278 = vst.msk [vmem:[#allocation17 + $0x8] sm:$0xff] %vm165_vm0, %v271_v36 }
  0xbf   :  { %388 = dma.vmem_to_hbm [thread:$0]  %s381_s2, 256, %s383_s3, [#allocation16], %s777_s26, %s777_s26, %s778_s27  }
 0x12b   :  { %v310_v38 = vpop.f32.mrf.mxu3 }
 0x12c   :  { %v311_v39 = vadd.f32 %v472_v37, %v310_v38 }
 0x12d   :  { %v342_v40 = vpop.f32.mrf.mxu0 }
 0x12e   :  { %317 = vst.msk [vmem:[#allocation18] sm:$0xff] %vm316_vm1, %v311_v39  ;;  %v343_v41 = vadd.f32 %v472_v37, %v342_v40 }
 0x130   :  { %348 = vst.msk [vmem:[#allocation20] sm:$0xff] %vm316_vm1, %v343_v41 }
 0x133   :  { %v313_v42 = vpop.f32.mrf.mxu3 }
 0x134   :  { %v314_v43 = vadd.f32 %v472_v37, %v313_v42 }
 0x135   :  { %v345_v44 = vpop.f32.mrf.mxu0 }
 0x136   :  { %318 = vst.msk [vmem:[#allocation18 + $0x8] sm:$0xff] %vm316_vm1, %v314_v43  ;;  %v346_v45 = vadd.f32 %v472_v37, %v345_v44 }
 0x137   :  { %401 = dma.vmem_to_hbm [thread:$0]  %s394_s5, 256, %s396_s19, [#allocation19], %s777_s26, %s777_s26, %s778_s27  }
 0x138   :  { %349 = vst.msk [vmem:[#allocation20 + $0x8] sm:$0xff] %vm316_vm1, %v346_v45 }
 0x139   :  { %414 = dma.vmem_to_hbm [thread:$0]  %s407_s20, 256, %s409_s7, [#allocation19], %s777_s26, %s777_s26, %s778_s27  }
 0x13a   :  { %770 = dma.done.wait [#allocation4], 256  }
 0x13b   :  { %771 = vsyncadd [#allocation4], 4294967040 }
 0x13c   :  { %772 = dma.done.wait [#allocation16], 512  }
 0x13d   :  { %773 = vsyncadd [#allocation16], 4294966784 }
 0x13e   :  { %774 = dma.done.wait [#allocation19], 512  }
 0x13f   :  { %775 = vsyncadd [#allocation19], 4294966784 }
 0x140   :  { %435 = vsyncpa [#allocation3], 1 }
 0x141   :  { %436 = vsyncpa [#allocation6], 1 }
 0x142   :  { %437 = vsyncpa [#allocation9], 1 }
 0x143   :  { %438 = vsyncpa [#allocation12], 1 }
 0x144   :  { %439 = vsyncpa [#allocation4], 1 }
 0x145   :  { %440 = vsyncpa [#allocation16], 1 }
 0x146   :  { %441 = vsyncpa [#allocation19], 1 }

</bundles_post_ra>
